<compile_context>
chip_gen: v6e
topology: v6e:2x2x1
jax: 0.10.0
libtpu: 0.0.40
codegen_flags: <defaults>
</compile_context>

<pallas_src>
import jax
import jax.numpy as jnp
from jax.experimental import pallas as pl
from jax.experimental.pallas import tpu as pltpu


def _se_kernel(w1t_ref, w2t_ref, x_ref, o_ref):
    # x_ref: (Bt, C, H*W) lane-dense block for the current batch tile.
    x = x_ref[...]

    # -- squeeze: global average pool over the (lane) spatial axis -> (Bt, C)
    pooled = jnp.mean(x.astype(jnp.float32), axis=-1)

    # -- excitation: fc1 (no bias) + ReLU, fc2 (no bias) + Sigmoid (MXU path)
    # w1t: (C, Cr), w2t: (Cr, C)  (weights pre-transposed in the wrapper)
    h = jnp.dot(pooled, w1t_ref[...].astype(jnp.float32),
                preferred_element_type=jnp.float32)          # (Bt, Cr)
    h = jnp.maximum(h, 0.0)
    g = jnp.dot(h, w2t_ref[...].astype(jnp.float32),
                preferred_element_type=jnp.float32)          # (Bt, C)
    g = jax.nn.sigmoid(g)

    # -- scale: x * gate broadcast over spatial; keep hot path in x's dtype
    o_ref[...] = (x * g.astype(x.dtype)[:, :, None]).astype(o_ref.dtype)


def _pick_batch_tile(B, C, HW, itemsize, budget_bytes=4 << 20):
    """Largest divisor of B whose per-step tile fits the budget; keep >=2 grid
    steps when possible so both v7x TensorCores get work."""
    best = 1
    for d in sorted((d for d in range(1, B + 1) if B % d == 0), reverse=True):
        tile_bytes = d * C * HW * itemsize
        if tile_bytes > budget_bytes:
            continue
        if B >= 2 and (B // d) < 2:
            continue
        return d
    return best


def se_block(x, w1, w2):
    """x: (B, C, H, W); w1: (Cr, C); w2: (C, Cr)  (PyTorch nn.Linear layout)."""
    B, C, H, W = x.shape
    Cr = w1.shape[0]
    assert w1.shape == (Cr, C) and w2.shape == (C, Cr)
    HW = H * W

    # Lane-dense layout: last dim H*W maps onto the 128-lane axis.
    x_flat = x.reshape(B, C, HW)
    # Transpose weights once in XLA (not in-kernel) so the FCs are plain dots.
    w1t = w1.T  # (C, Cr)
    w2t = w2.T  # (Cr, C)

    itemsize = x.dtype.itemsize
    Bt = _pick_batch_tile(B, C, HW, itemsize)
    grid = (B // Bt,)

    tile_bytes = Bt * C * HW * itemsize
    w_bytes = w1t.size * w1t.dtype.itemsize + w2t.size * w2t.dtype.itemsize
    # weights + double-buffered in/out tiles + headroom, capped at v7x physical.
    vmem_limit = int(min(64 << 20, w_bytes + 4 * tile_bytes + (8 << 20)))

    out_flat = pl.pallas_call(
        _se_kernel,
        out_shape=jax.ShapeDtypeStruct((B, C, HW), x.dtype),
        grid_spec=pltpu.PrefetchScalarGridSpec(
            num_scalar_prefetch=0,
            grid=grid,
            in_specs=[
                pl.BlockSpec((C, Cr), lambda b: (0, 0)),          # w1.T (full, reused)
                pl.BlockSpec((Cr, C), lambda b: (0, 0)),          # w2.T (full, reused)
                pl.BlockSpec((Bt, C, HW), lambda b: (b, 0, 0)),   # x batch tile
            ],
            out_specs=pl.BlockSpec((Bt, C, HW), lambda b: (b, 0, 0)),
        ),
        compiler_params=pltpu.CompilerParams(
            dimension_semantics=("parallel",),
            vmem_limit_bytes=vmem_limit,
        ),
    )(w1t, w2t, x_flat)

    return out_flat.reshape(B, C, H, W)


def se_block_ref(x, w1, w2):
    # pure-JAX reference of the PyTorch forward
    pooled = jnp.mean(x, axis=(2, 3))                 # (B, C)
    h = jnp.maximum(pooled @ w1.T, 0.0)               # (B, Cr)
    g = jax.nn.sigmoid(h @ w2.T)                      # (B, C)
    return x * g[:, :, None, None]


if __name__ == "__main__":
    # SEBlock(num_features=4, reduction=16) -> num_reduced = ceil(4/16) = 1
    B, C, H, W = 2, 4, 16, 16
    reduction = 16
    Cr = (C + reduction - 1) // reduction

    key = jax.random.PRNGKey(0)
    kx, k1, k2 = jax.random.split(key, 3)
    x = jax.random.normal(kx, (B, C, H, W), dtype=jnp.float32)
    # deterministic synthetic weights (nn.Linear layout: (out_features, in_features))
    w1 = jax.random.normal(k1, (Cr, C), dtype=jnp.float32) * 0.5
    w2 = jax.random.normal(k2, (C, Cr), dtype=jnp.float32) * 0.5

    out = jax.block_until_ready(se_block(x, w1, w2))

    ref = se_block_ref(x, w1, w2)
    assert out.shape == (B, C, H, W)
    assert jnp.allclose(out, ref, rtol=1e-5, atol=1e-5), "mismatch vs reference"

    print("KERNEL_OK")
</pallas_src>

<mosaic_0001>
module attributes {stable_mosaic.version = 11 : i64} {
  func.func @_se_kernel(%arg0: i32, %arg1: memref<4x1xf32, #tpu.memory_space<vmem>>, %arg2: memref<1x4xf32, #tpu.memory_space<vmem>>, %arg3: memref<1x4x256xf32, #tpu.memory_space<vmem>>, %arg4: memref<1x4x256xf32, #tpu.memory_space<vmem>>) attributes {dimension_semantics = [#tpu.dimension_semantics<parallel>], iteration_bounds = array<i64: 2>, scalar_prefetch = 0 : i64, scratch_operands = 0 : i64, tpu.core_type = #tpu.core_type<tc>, window_params = [{pipeline_mode = #tpu.pipeline_mode<synchronous>, transform_indices = @transform_0, window_bounds = array<i64: 4, 1>}, {pipeline_mode = #tpu.pipeline_mode<synchronous>, transform_indices = @transform_1, window_bounds = array<i64: 1, 4>}, {transform_indices = @transform_2, window_bounds = array<i64: 1, 4, 256>}, {transform_indices = @transform_3, window_bounds = array<i64: 1, 4, 256>}]} {
    %c0 = arith.constant 0 : index
    %c0_0 = arith.constant 0 : index
    %c0_1 = arith.constant 0 : index
    %0 = vector.load %arg3[%c0, %c0_0, %c0_1] : memref<1x4x256xf32, #tpu.memory_space<vmem>>, vector<1x4x256xf32>
    %cst = arith.constant dense<0.000000e+00> : vector<1x4xf32>
    %1 = vector.multi_reduction <add>, %0, %cst [2] : vector<1x4x256xf32> to vector<1x4xf32>
    %cst_2 = arith.constant 2.560000e+02 : f32
    %2 = vector.broadcast %cst_2 : f32 to vector<1x4xf32>
    %3 = arith.divf %1, %2 : vector<1x4xf32>
    %c0_3 = arith.constant 0 : index
    %c0_4 = arith.constant 0 : index
    %4 = vector.load %arg1[%c0_3, %c0_4] : memref<4x1xf32, #tpu.memory_space<vmem>>, vector<4x1xf32>
    %cst_5 = arith.constant dense<0.000000e+00> : vector<1x1xf32>
    %5 = tpu.matmul %3, %4, %cst_5 {dimension_numbers = #tpu.dot_dimension_numbers<[1], [0], [0], [1], [0, 0, 1, 1], [], []>} : vector<1x4xf32>, vector<4x1xf32>, vector<1x1xf32> -> vector<1x1xf32>
    %cst_6 = arith.constant 0.000000e+00 : f32
    %6 = vector.broadcast %cst_6 : f32 to vector<1x1xf32>
    %7 = arith.maximumf %5, %6 : vector<1x1xf32>
    %c0_7 = arith.constant 0 : index
    %c0_8 = arith.constant 0 : index
    %8 = vector.load %arg2[%c0_7, %c0_8] : memref<1x4xf32, #tpu.memory_space<vmem>>, vector<1x4xf32>
    %cst_9 = arith.constant dense<0.000000e+00> : vector<1x4xf32>
    %9 = tpu.matmul %7, %8, %cst_9 {dimension_numbers = #tpu.dot_dimension_numbers<[1], [0], [0], [1], [0, 0, 1, 1], [], []>} : vector<1x1xf32>, vector<1x4xf32>, vector<1x4xf32> -> vector<1x4xf32>
    %10 = arith.negf %9 : vector<1x4xf32>
    %11 = math.exp %10 : vector<1x4xf32>
    %cst_10 = arith.constant 1.000000e+00 : f32
    %12 = vector.broadcast %cst_10 : f32 to vector<1x4xf32>
    %13 = arith.addf %12, %11 : vector<1x4xf32>
    %14 = arith.divf %12, %13 : vector<1x4xf32>
    %15 = vector.shape_cast %14 : vector<1x4xf32> to vector<1x4x1xf32>
    %16 = vector.broadcast %15 : vector<1x4x1xf32> to vector<1x4x256xf32>
    %17 = arith.mulf %0, %16 : vector<1x4x256xf32>
    %c0_11 = arith.constant 0 : index
    %c0_12 = arith.constant 0 : index
    %c0_13 = arith.constant 0 : index
    %18 = vector.load %arg4[%c0_11, %c0_12, %c0_13] : memref<1x4x256xf32, #tpu.memory_space<vmem>>, vector<1x4x256xf32>
    tpu.vector_store %arg4[%c0_11, %c0_12, %c0_13], %17 {strides = array<i32>} : memref<1x4x256xf32, #tpu.memory_space<vmem>>, vector<1x4x256xf32>,
    return
  }
  func.func @transform_0(%arg0: i32) -> (i32, i32) {
    %c0_i32 = arith.constant 0 : i32
    %c0_i32_0 = arith.constant 0 : i32
    %c0_i32_1 = arith.constant 0 : i32
    return %c0_i32, %c0_i32_0 : i32, i32
  }
  func.func @transform_1(%arg0: i32) -> (i32, i32) {
    %c0_i32 = arith.constant 0 : i32
    %c0_i32_0 = arith.constant 0 : i32
    %c0_i32_1 = arith.constant 0 : i32
    return %c0_i32, %c0_i32_0 : i32, i32
  }
  func.func @transform_2(%arg0: i32) -> (i32, i32, i32) {
    %c0_i32 = arith.constant 0 : i32
    %c0_i32_0 = arith.constant 0 : i32
    %c0_i32_1 = arith.constant 0 : i32
    return %arg0, %c0_i32, %c0_i32_0 : i32, i32, i32
  }
  func.func @transform_3(%arg0: i32) -> (i32, i32, i32) {
    %c0_i32 = arith.constant 0 : i32
    %c0_i32_0 = arith.constant 0 : i32
    %c0_i32_1 = arith.constant 0 : i32
    return %arg0, %c0_i32, %c0_i32_0 : i32, i32, i32
  }
}

</mosaic_0001>

<bundles_post_ra>
// kernel: tpu_custom_call.1
= control target key start
LH: loop header
LB: loop body
LE: loop exit
PB: predicated region body
PF: predicated region fallthrough
CT: control target
= control target key end

     0   :  { %8 = vsyncpa [#allocation3], 0  ;;  %s831_s0 = inlined_call_operand.vmem [shape: f32[4,1], index: 0, kind: input, shape index: {}]   ;;  %s832_s1 = inlined_call_operand.vmem [shape: f32[1,4], index: 1, kind: input, shape index: {}]   ;;  %s833_s2 = inlined_call_operand.hbm [shape: f32[2,4,256], index: 2, kind: input, shape index: {}]   ;;  %s834_s3 = inlined_call_operand.hbm [shape: f32[2,4,256], index: 3, kind: output, shape index: {}]  }
   0x1   :  { %10 = vsyncpa [#allocation3 + $0x1], 0 }
   0x2   :  { %11 = vsyncpa [#allocation4], 0 }
   0x3   :  { %13 = vsyncpa [#allocation4 + $0x1], 0  ;;  %s680_s12 = smov 0   ;;  %s682_s13 = smov 0  }
   0x4   :  { %s684_s14 = smov 0   ;;  %s686_s15 = smov 0  }
   0x5 LB: > { %s701_s16 = sadd.s32 4294967295, %s653_s15   ;;  %s472_s17 = sadd.s32 4294967294, %s653_s15   ;;  %s653_s15 = sphi %s686_s15, %s851_s15   ;;  %s649_s14 = sphi %s684_s14, %s850_s14   ;;  %s645_s13 = sphi %s682_s13, %s849_s13   ;;  %s641_s12 = sphi %s680_s12, %s848_s12  }
   0x6   : > { %s705_s18 = sadd.s32 1, %s653_s15   ;;  %s68_s19 = sadd.s32 1, %s649_s14 }
   0x7   : > { %s65_s20 = ssub.s32 %s653_s15, %s705_s18  ;;  %p75_p0 = scmp.ne.s32.totalorder %s649_s14, %s645_s13 }
   0x8   : > { %p66_p1 = scmp.eq.s32.totalorder %s65_s20, 0  ;;  %p76_p2 = scmp.eq.s32.totalorder %s653_s15, 0 }
   0x9   : > { %p81_p3 = scmp.ne.s32.totalorder %s645_s13, %s641_s12  ;;  %p82_p4 = scmp.eq.s32.totalorder %s701_s16, 0 }
   0xa   : > { %s717_s21 = scalar_select %p66_p1, %s649_s14, %s68_s19  }
   0xb   : > { %p719_p5 = por %p76_p2, %p75_p0  ;;  %p723_p6 = por %p82_p4, %p81_p3 }
   0xc   : > { %p105_p7 = scmp.eq.s32.totalorder %s701_s16, 1  ;;  %p111_p8 = scmp.eq.s32.totalorder %s472_s17, 1 }
   0xd   : > { %s838_s23 = scalar_select %p723_p6, 1, 0 }
   0xe   : > { %p519_p10 = scmp.lt.s32.totalorder %s653_s15, 2  ;;  %p730_p11 = por %p105_p7, %p75_p0 }
   0xf   : > { %p734_p12 = por %p111_p8, %p81_p3  ;;  %s137_s26 = sand.u32 1, %s649_s14  }
  0x10   : > { %s839_s24 = scalar_select %p730_p11, 1, 0 }
  0x11   : > { %s840_s25 = scalar_select %p734_p12, 1, 0 }
  0x12   : > { %s491_s27 = sshll.u32 %s653_s15, 7  ;;  %s475_s28 = sshll.u32 %s137_s26, 3 }
  0x13   : > { %s743_s4 = scalar_lea.hbm %s833_s2, %s491_s27  ;;  %s141_s5 = scalar_lea.vmem [#allocation2], %s475_s28 }
  0x14   : > { %s149_s6 = sshll.u32 %s141_s5, 4  ;;  %p747_p13 = pnand %p519_p10, %p719_p5  ;;  %s751_s6 = int_to_ptr.vmem [resolvable:$true] %s149_s6 }
  0x15   : > { %s138_s8 = scalar_lea.sflag [#allocation3], %s137_s26  ;;  %s561_s9 = scalar_lea.hbm %s743_s4, 128 }
  0x16   : > { %p562_p2 = scmp.ne.s32.totalorder %s743_s4, %s561_s9  ;;  %p563_p3 = pneg %p747_p13 }
  0x17   : > { %s566_s17 = scalar_lea.hbm %s833_s2, 256  ;;  %p567_p5 = scmp.lt.s32.totalorder %s743_s4, %s833_s2 }
  0x18   : > { %p564_p4 = pnand %p563_p3, %p562_p2  ;;  %p568_p8 = scmp.lt.s32.totalorder %s566_s17, %s561_s9 }
  0x1a   : > { %p565_p7 = pneg %p564_p4  ;;  %p569_p10 = por %p568_p8, %p567_p5 }
  0x1c   : > { %p570_p9 = pnand %p569_p10, %p565_p7 }
  0x1e   : > { %573 = shalt.err (!%p570_p9)
}
  0x1f   : > { %s574_s22 = scalar_lea.vmem %s751_s6, 128  ;;  %s655_s26 = smov [#allocation2]  }
  0x20   : > { %p575_p0 = scmp.ne.s32.totalorder %s751_s6, %s574_s22  ;;  %s579_s27 = sshll.u32 %s655_s26, 4  ;;  %s580_s27 = int_to_ptr.vmem [resolvable:$false] %s579_s27 }
  0x21   : > { %s581_s28 = scalar_lea.vmem %s580_s27, 256  ;;  %p582_p4 = scmp.lt.s32.totalorder %s751_s6, %s580_s27 }
  0x22   : > { %p577_p1 = pnand %p575_p0, %p563_p3  ;;  %p583_p12 = scmp.lt.s32.totalorder %s581_s28, %s574_s22 }
  0x24   : > { %p578_p2 = pneg %p577_p1  ;;  %p584_p11 = por %p583_p12, %p582_p4 }
  0x26   : > { %p585_p6 = pnand %p584_p11, %p578_p2 }
  0x28   : > { %588 = shalt.err (!%p585_p6)
}
  0x29   : > { %514 = dma.hbm_to_vmem [thread:$0]  (!%p747_p13), %s743_s4, 128, %s751_s6, %s138_s8  }
  0x2a   : > { %p842_p9 = scmp.lt.s32.totalorder %s653_s15, 3  ;;  %p843_p7 = scmp.ge.s32.totalorder %s653_s15, 1 }
  0x2c   : > { %p155_p0 = pnand %p843_p7, %p842_p9 }
  0x2d   : > { %s778_s29 = sand.u32 (!%p155_p0), 1, %s645_s13   ;;  %p844_p6 = scmp.ne.s32.totalorder (!%p155_p0), %s838_s23, 0 }
  0x2e   : > { %158 = sbr.rel (%p155_p0) target bundleno = 754 (0x2f2), region = 32  ;;  %s479_s30 = sshll.u32 (!%p155_p0), %s778_s29, 3 }
  0x2f   : > { %s161_s5 = scalar_lea.sflag (!%p155_p0), [#allocation3], %s778_s29  ;;  %s164_s7 = scalar_lea.vmem (!%p155_p0), [#allocation2], %s479_s30 }
  0x33   : > { %632 = dma.done.wait (%p844_p6), %s161_s5, 128  }
  0x34   : > { %634 = vsyncadd (%p844_p6), %s161_s5, 4294967168  ;;  %vm191_vm0 = vcmask 1043456   ;;  %v187_v0 = vld [vmem:[%s164_s7] sm:$0xff]  ;;  %v656_v5 = vmov 0.0   ;;  %vm657_vm1 = vmmov 0   ;;  %v201_v7 = vlaneseq  ;;  %s492_s9 = sshll.u32 %s701_s16, 7 }
  0x35   : > { %v189_v1 = vcombine.high %v187_v0, %v187_v0  ;;  %v192_v2 = vsel %vm191_vm0, %v187_v0, 0.0  ;;  %497 = vmatprep.subr.mxu0 %v656_v5  ;;  %v199_v6 = vld [vmem:[%s831_s0] sm:$0xf]  ;;  %502 = vmatprep.subr.mxu1 %v656_v5  ;;  %vm207_vm2 = vcmask 31744   ;;  %vm289_vm3 = vcmask 1040384   ;;  %s186_s10 = scalar_lea.vmem [#allocation5], %s479_s30  ;;  %s400_s20 = scalar_lea.hbm %s834_s3, %s492_s9 }
  0x36   : > { %498 = vmatpush3.msk.msra.mxu0 %vm191_vm0, %v199_v6  ;;  %499 = vmatprep.mubr.msk.f32.mxu0 %vm657_vm1, %v656_v5  ;;  %v202_v8 = vand.u32 127, %v201_v7  ;;  %v204_v9 = vshrl.u32 %v201_v7, 7  ;;  %v284_v14 = vld [vmem:[%s832_s1] sm:$0x1]  ;;  %vm285_vm4 = vcmask 7168   ;;  %s402_s11 = sshll.u32 %s186_s10, 4  ;;  %s403_s11 = int_to_ptr.vmem [resolvable:$true] %s402_s11 }
  0x37   : > { %v193_v3 = vsel %vm191_vm0, %v189_v1, 0.0  ;;  %504 = vmatprep.mubr.msk.f32.mxu1 %vm657_vm1, %v656_v5  ;;  %503 = vmatpush3.msk.msra.mxu1 %vm289_vm3, %v284_v14  ;;  %v658_v26 = vmov 839922192   ;;  %s388_s22 = scalar_lea.sflag [#allocation4], %s778_s29  ;;  %s589_s26 = scalar_lea.vmem %s403_s11, 128 }
  0x38   : > { %v194_v4 = vadd.f32 %v193_v3, %v192_v2  ;;  %v205_v10 = vsub.s32 %v202_v8, %v204_v9  ;;  %v371_v23 = vsub.s32 0, %v204_v9  ;;  %v378_v27 = vunpack.c.l.s4 %v658_v26  ;;  %p590_p11 = scmp.ne.s32.totalorder %s403_s11, %s589_s26  ;;  %p845_p12 = scmp.ne.s32.totalorder %s839_s24, 0 }
  0x39   : > { %s659_s27 = smov [#allocation5]  }
  0x3a   : > { %195 = vadd.xlane.f32.xlu0 %v194_v4  ;;  %v379_v28 = vunpack.c.0.s8 %v378_v27  ;;  %p591_p13 = pnand %p590_p11, %p845_p12  ;;  %s593_s28 = sshll.u32 %s659_s27, 4  ;;  %s594_s28 = int_to_ptr.vmem [resolvable:$false] %s593_s28 }
  0x3b   : > { %s595_s16 = scalar_lea.vmem %s594_s28, 256  ;;  %p596_p3 = scmp.lt.s32.totalorder %s403_s11, %s594_s28 }
  0x3c   : > { %v382_v29 = vsub.s32 %v379_v28, %v204_v9  ;;  %p592_p1 = pneg %p591_p13  ;;  %p597_p5 = scmp.lt.s32.totalorder %s595_s16, %s589_s26 }
  0x3e   : > { %p598_p8 = por %p597_p5, %p596_p3 }
  0x40   : > { %p599_p10 = pnand %p598_p8, %p592_p1 }
  0xc3   : > { %v196_v11 = vpop.xlane.xlu0 %195 }
  0xc4   : > { %v198_v12 = vmul.f32 0.00390625, %v196_v11 }
  0xc6   : > { %v206_v13 = vrot.slane %v198_v12, %v205_v10 }
  0xc8   : > { %500 = vmatmul.mubr.msk.f32.vlgmr.msra.gmra.mxu0 %vm207_vm2, %v206_v13 }
 0x188   : > { %v279_v15 = vpop.f32.mrf.mxu0 }
 0x189   : > { %v283_v16 = vmax.f32 %v279_v15, 0.0 }
 0x18a   : > { %v501_v17 = vpop.f32.mrf.mxu0 }
 0x18b   : > { %505 = vmatmul.mubr.msk.f32.vlgmr.msra.gmra.mxu1 %vm285_vm4, %v283_v16 }
 0x24b   : > { %v359_v18 = vpop.f32.mrf.mxu1 }
 0x24c   : > { %v485_v19 = vmul.f32 -1.442695, %v359_v18 }
 0x24d   : > { %v506_v20 = vpop.f32.mrf.mxu1 }
 0x24e   : > { %557 = vpow2.f32 %v485_v19 }
 0x25b   : > { %v558_v21 = vpop.eup %557 }
 0x25c   : > { %v366_v22 = vadd.f32 1.0, %v558_v21 }
 0x25e   : > { %559 = vrcp.f32 %v366_v22 }
 0x26b   : > { %v560_v24 = vpop.eup %559 }
 0x26c   : > { %v372_v25 = vrot.slane %v560_v24, %v371_v23 }
 0x26e   : > { %374 = vbcast.lane.b32.xlu0 %v372_v25, 256 }
 0x2e0   : > { %v375_v30 = vpop.permute.xlu0 %374 }
 0x2e1   : > { %v383_v31 = vrot.slane %v375_v30, %v382_v29 }
 0x2e3   : > { %v385_v32 = vmul.f32 %v383_v31, %v187_v0 }
 0x2e5   : > { %386 = vst [vmem:[%s186_s10] sm:$0xff] %v385_v32 }
 0x2e6   : > { %602 = shalt.err (!%p599_p10)
}
 0x2e7   : > { %s603_s30 = scalar_lea.hbm %s400_s20, 128  ;;  %s607_s7 = scalar_lea.hbm %s834_s3, 256 }
 0x2e8   : > { %p604_p2 = scmp.ne.s32.totalorder %s400_s20, %s603_s30  ;;  %p608_p7 = scmp.lt.s32.totalorder %s400_s20, %s834_s3 }
 0x2e9   : > { %p609_p0 = scmp.lt.s32.totalorder %s607_s7, %s603_s30 }
 0x2ea   : > { %p605_p4 = pnand %p604_p2, %p845_p12 }
 0x2eb   : > { %p610_p6 = por %p609_p0, %p608_p7 }
 0x2ec   : > { %p606_p9 = pneg %p605_p4 }
 0x2ee   : > { %p611_p11 = pnand %p610_p6, %p606_p9 }
 0x2f0   : > { %614 = shalt.err (!%p611_p11)
}
 0x2f1   : > { %509 = dma.vmem_to_hbm [thread:$0]  (%p845_p12), %s403_s11, 128, %s400_s20, %s388_s22  }
 0x2f2 PF: > { %s414_s23 = sand.u32 1, %s641_s12   ;;  %p846_p13 = scmp.ne.s32.totalorder %s840_s25, 0 }
 0x2f3   : > { %p847_p1 = scmp.ge.s32.totalorder %s653_s15, 2  ;;  %s415_s8 = scalar_lea.sflag [#allocation4], %s414_s23 }
 0x2f5   : > { %p516_p3 = pnand %p847_p1, %p846_p13 }
 0x2f7   : > { %p517_p5 = pneg %p516_p3 }
 0x2f9   : > { %636 = dma.done.wait (%p517_p5), %s415_s8, 128  }
 0x2fa   : > { %638 = vsyncadd (%p517_p5), %s415_s8, 4294967168  ;;  %p16_p8 = scmp.ge.s32.totalorder %s705_s18, 4   ;;  %s848_s12 = smov %s645_s13 }
 0x2fb   : > { %s849_s13 = smov %s649_s14  ;;  %s850_s14 = smov %s717_s21 }
 0x2fc   : > { %s851_s15 = smov %s705_s18  ;;  %18 = sbr.rel (!%p16_p8) target bundleno = 5 (0x5), region = 77 }
 0x301   :  { %420 = vsyncpa [#allocation3], 1 }
 0x302   :  { %422 = vsyncpa [#allocation3 + $0x1], 1 }
 0x303   :  { %423 = vsyncpa [#allocation4], 1 }
 0x304   :  { %425 = vsyncpa [#allocation4 + $0x1], 1 }

</bundles_post_ra>
